<compile_context>
chip_gen: v7x
topology: tpu7x:2x2x1
jax: 0.10.0
libtpu: 0.0.40
codegen_flags: <defaults>
</compile_context>

<pallas_src>
import jax
import jax.numpy as jnp
from jax.experimental import pallas as pl
from jax.experimental.pallas import tpu as pltpu

_LANE = 128
_SUBLANE = 8


def _round_up(n, m):
    return ((n + m - 1) // m) * m


def _mlp_kernel(x_ref, w1_ref, b1_ref, w2_ref, b2_ref, o_ref):
    # ReLU on the VPU; cast to the matmul dtype *inside* the kernel so the x
    # HBM read stays at its original width (cast is free filler under DMA).
    x = jnp.maximum(x_ref[...], 0.0).astype(w1_ref.dtype)
    # fc1: x @ W1 + b1 (MXU, f32 accumulate; bias add in f32)
    h = jnp.dot(x, w1_ref[...], preferred_element_type=jnp.float32) + b1_ref[...]
    # dropout: identity at inference time (PyTorch eval semantics)
    # TODO(synk): training-mode dropout (per-tile pltpu.prng_random_bits mask,
    # seeded with program_id) not implemented.
    h = jax.nn.sigmoid(h)  # exp lands in the EUP slot, VALU stays free
    # fc2: h @ W2 + b2
    y = jnp.dot(h.astype(w2_ref.dtype), w2_ref[...],
                preferred_element_type=jnp.float32) + b2_ref[...]
    o_ref[...] = y.astype(o_ref.dtype)


def prepare_params(w1, b1, w2, b2, *, matmul_dtype=None):
    """One-time weight prep (do this once, reuse across forward calls).

    w1: [F, H], b1: [H], w2: [H, C], b2: [C]  (weights transposed vs. PyTorch)

    Pads the lane dims H and C up to multiples of 128 so both MXU passes are
    dense and the output store is unmasked.  Zero padding is exact: padded
    hidden columns get bias 0 -> sigmoid(0)=0.5, which multiplies zero rows of
    W2; padded output columns are sliced off by the wrapper.  x's feature dim
    F is deliberately NOT padded (MXU tolerates K < 128).
    """
    F, H = w1.shape
    C = w2.shape[1]
    Hp = _round_up(H, _LANE)
    Cp = _round_up(C, _LANE)

    w1p = jnp.pad(w1, ((0, 0), (0, Hp - H)))
    b1p = jnp.pad(b1.reshape(1, H).astype(jnp.float32), ((0, 0), (0, Hp - H)))
    w2p = jnp.pad(w2, ((0, Hp - H), (0, Cp - C)))
    b2p = jnp.pad(b2.reshape(1, C).astype(jnp.float32), ((0, 0), (0, Cp - C)))

    if matmul_dtype is not None:  # e.g. jnp.bfloat16 on v6e/v7x
        w1p = w1p.astype(matmul_dtype)
        w2p = w2p.astype(matmul_dtype)

    return {"w1": w1p, "b1": b1p, "w2": w2p, "b2": b2p, "F": F, "C": C}


def mlp_forward(x, params, *, batch_tile=1024):
    """Fused ReLU -> Linear -> Sigmoid -> Linear.  x: [B, F] -> [B, C] f32."""
    w1p, b1p, w2p, b2p = params["w1"], params["b1"], params["w2"], params["b2"]
    C = params["C"]
    B, F = x.shape
    assert F == params["F"], "feature dim mismatch with prepared params"
    Hp = w1p.shape[1]
    Cp = w2p.shape[1]

    weight_bytes = (w1p.size * w1p.dtype.itemsize
                    + w2p.size * w2p.dtype.itemsize
                    + (b1p.size + b2p.size) * 4)
    # Resident-weight strategy guard (v7x physical VMEM is only 64 MiB).
    assert weight_bytes <= 24 * 1024 * 1024, "weights too large to keep resident in VMEM"
    # TODO(synk): K-tiled (Hp-grid) fallback with an f32 accumulator scratch for
    # weight sets that exceed the resident budget.

    def _vmem_limit(tile_rows):
        foot = (2 * tile_rows * F * x.dtype.itemsize   # x tile, double-buffered
                + 2 * tile_rows * Cp * 4               # out tile, double-buffered
                + tile_rows * Hp * 4                   # hidden activation
                + 2 * weight_bytes)                    # resident weights (2 bufs)
        return int(min(max(2 * foot, 4 << 20), 64 << 20))

    if B <= batch_tile:
        # Small batch: single invocation, everything resident in VMEM, no grid
        # loop / pipeline prologue.
        out_p = pl.pallas_call(
            _mlp_kernel,
            out_shape=jax.ShapeDtypeStruct((B, Cp), jnp.float32),
            in_specs=[pl.BlockSpec(memory_space=pltpu.VMEM)] * 5,
            out_specs=pl.BlockSpec(memory_space=pltpu.VMEM),
            compiler_params=pltpu.CompilerParams(
                vmem_limit_bytes=_vmem_limit(B)),
        )(x, w1p, b1p, w2p, b2p)
        return out_p[:, :C]

    # Large batch: tile the batch dim; weights/biases stay resident in VMEM
    # (constant index_map).  Clamp the tile so the grid has >= 4 steps
    # (>= 2 per TensorCore on v7x -> DMA/compute overlap); the ragged last
    # block is handled by Pallas' masked writeback (rows are independent, so
    # garbage overhang rows never reach HBM).
    bt = min(batch_tile, max(_SUBLANE, _round_up(pl.cdiv(B, 4), _SUBLANE)))
    num_tiles = pl.cdiv(B, bt)

    out_p = pl.pallas_call(
        _mlp_kernel,
        out_shape=jax.ShapeDtypeStruct((B, Cp), jnp.float32),
        grid=(num_tiles,),
        in_specs=[
            pl.BlockSpec((bt, F), lambda i: (i, 0)),   # last dim == full F (legal)
            pl.BlockSpec((F, Hp), lambda i: (0, 0)),   # resident weights
            pl.BlockSpec((1, Hp), lambda i: (0, 0)),
            pl.BlockSpec((Hp, Cp), lambda i: (0, 0)),
            pl.BlockSpec((1, Cp), lambda i: (0, 0)),
        ],
        out_specs=pl.BlockSpec((bt, Cp), lambda i: (i, 0)),  # lane-dense store
        compiler_params=pltpu.CompilerParams(
            dimension_semantics=("parallel",),
            vmem_limit_bytes=_vmem_limit(bt),
        ),
    )(x, w1p, b1p, w2p, b2p)
    return out_p[:, :C]


if __name__ == "__main__":
    # Small config consistent with the module:
    #   num_features=32, num_hidden=64, num_classes=16, batch=8
    B, F, H, C = 8, 32, 64, 16

    key = jax.random.PRNGKey(0)
    kx, kw1, kb1, kw2, kb2 = jax.random.split(key, 5)

    x = jax.random.normal(kx, (B, F), dtype=jnp.float32)
    w1 = jax.random.uniform(kw1, (F, H), dtype=jnp.float32,
                            minval=-1.0, maxval=1.0) / jnp.sqrt(F)
    b1 = jax.random.uniform(kb1, (H,), dtype=jnp.float32,
                            minval=-1.0, maxval=1.0) / jnp.sqrt(F)
    w2 = jax.random.uniform(kw2, (H, C), dtype=jnp.float32,
                            minval=-1.0, maxval=1.0) / jnp.sqrt(H)
    b2 = jax.random.uniform(kb2, (C,), dtype=jnp.float32,
                            minval=-1.0, maxval=1.0) / jnp.sqrt(H)

    def ref_fn(xv):
        h = jnp.maximum(xv, 0.0) @ w1 + b1
        return jax.nn.sigmoid(h) @ w2 + b2

    # One-time weight prep (reused across all forward calls below).
    params_f32 = prepare_params(w1, b1, w2, b2)

    # Small-batch (no-grid) path, f32
    out = jax.block_until_ready(mlp_forward(x, params_f32))
    assert out.shape == (B, C)
    assert jnp.allclose(out, ref_fn(x), atol=1e-5, rtol=1e-5)

    # Batch-tiled path (grid over batch tiles, resident weights, ragged last block)
    Bbig = 4100
    xbig = jax.random.normal(jax.random.PRNGKey(1), (Bbig, F), dtype=jnp.float32)
    out_big = jax.block_until_ready(mlp_forward(xbig, params_f32, batch_tile=1024))
    assert out_big.shape == (Bbig, C)
    assert jnp.allclose(out_big, ref_fn(xbig), atol=1e-5, rtol=1e-5)

    # bf16-MXU variant (weights pre-cast once; x cast in-kernel), loose tolerance.
    params_bf16 = prepare_params(w1, b1, w2, b2, matmul_dtype=jnp.bfloat16)
    out_bf16 = jax.block_until_ready(mlp_forward(x, params_bf16))
    assert out_bf16.shape == (B, C)
    assert jnp.allclose(out_bf16, ref_fn(x), atol=2e-2, rtol=2e-2)

    print("KERNEL_OK")
</pallas_src>

<mosaic_0001>
module attributes {stable_mosaic.version = 11 : i64} {
  func.func @_mlp_kernel(%arg0: memref<8x32xf32, #tpu.memory_space<vmem>>, %arg1: memref<32x128xf32, #tpu.memory_space<vmem>>, %arg2: memref<1x128xf32, #tpu.memory_space<vmem>>, %arg3: memref<128x128xf32, #tpu.memory_space<vmem>>, %arg4: memref<1x128xf32, #tpu.memory_space<vmem>>, %arg5: memref<8x128xf32, #tpu.memory_space<vmem>>) attributes {dimension_semantics = [], scalar_prefetch = 0 : i64, scratch_operands = 0 : i64, tpu.core_type = #tpu.core_type<tc>} {
    %c0 = arith.constant 0 : index
    %c0_0 = arith.constant 0 : index
    %0 = vector.load %arg0[%c0, %c0_0] : memref<8x32xf32, #tpu.memory_space<vmem>>, vector<8x32xf32>
    %cst = arith.constant 0.000000e+00 : f32
    %1 = vector.broadcast %cst : f32 to vector<8x32xf32>
    %2 = arith.maximumf %0, %1 : vector<8x32xf32>
    %c0_1 = arith.constant 0 : index
    %c0_2 = arith.constant 0 : index
    %3 = vector.load %arg1[%c0_1, %c0_2] : memref<32x128xf32, #tpu.memory_space<vmem>>, vector<32x128xf32>
    %cst_3 = arith.constant dense<0.000000e+00> : vector<8x128xf32>
    %4 = tpu.matmul %2, %3, %cst_3 {dimension_numbers = #tpu.dot_dimension_numbers<[1], [0], [0], [1], [0, 0, 1, 1], [], []>} : vector<8x32xf32>, vector<32x128xf32>, vector<8x128xf32> -> vector<8x128xf32>
    %c0_4 = arith.constant 0 : index
    %c0_5 = arith.constant 0 : index
    %5 = vector.load %arg2[%c0_4, %c0_5] : memref<1x128xf32, #tpu.memory_space<vmem>>, vector<1x128xf32>
    %6 = vector.broadcast %5 : vector<1x128xf32> to vector<8x128xf32>
    %7 = arith.addf %4, %6 : vector<8x128xf32>
    %8 = arith.negf %7 : vector<8x128xf32>
    %9 = math.exp %8 : vector<8x128xf32>
    %cst_6 = arith.constant 1.000000e+00 : f32
    %10 = vector.broadcast %cst_6 : f32 to vector<8x128xf32>
    %11 = arith.addf %10, %9 : vector<8x128xf32>
    %12 = arith.divf %10, %11 : vector<8x128xf32>
    %c0_7 = arith.constant 0 : index
    %c0_8 = arith.constant 0 : index
    %13 = vector.load %arg3[%c0_7, %c0_8] : memref<128x128xf32, #tpu.memory_space<vmem>>, vector<128x128xf32>
    %cst_9 = arith.constant dense<0.000000e+00> : vector<8x128xf32>
    %14 = tpu.matmul %12, %13, %cst_9 {dimension_numbers = #tpu.dot_dimension_numbers<[1], [0], [0], [1], [0, 0, 1, 1], [], []>} : vector<8x128xf32>, vector<128x128xf32>, vector<8x128xf32> -> vector<8x128xf32>
    %c0_10 = arith.constant 0 : index
    %c0_11 = arith.constant 0 : index
    %15 = vector.load %arg4[%c0_10, %c0_11] : memref<1x128xf32, #tpu.memory_space<vmem>>, vector<1x128xf32>
    %16 = vector.broadcast %15 : vector<1x128xf32> to vector<8x128xf32>
    %17 = arith.addf %14, %16 : vector<8x128xf32>
    %c0_12 = arith.constant 0 : index
    %c0_13 = arith.constant 0 : index
    %18 = vector.load %arg5[%c0_12, %c0_13] : memref<8x128xf32, #tpu.memory_space<vmem>>, vector<8x128xf32>
    tpu.vector_store %arg5[%c0_12, %c0_13], %17 {strides = array<i32>} : memref<8x128xf32, #tpu.memory_space<vmem>>, vector<8x128xf32>,
    return
  }
}

</mosaic_0001>

<bundles_post_ra>
// kernel: tpu_custom_call.1
= control target key start
LH: loop header
LB: loop body
LE: loop exit
PB: predicated region body
PF: predicated region fallthrough
CT: control target
= control target key end

     0   :  { %10 = vsyncpa [#allocation3], 0  ;;  %s571_s0 = inlined_call_operand.hbm [shape: f32[8,32], index: 0, kind: input, shape index: {}]   ;;  %s572_s1 = inlined_call_operand.hbm [shape: f32[32,128], index: 1, kind: input, shape index: {}]   ;;  %s573_s2 = inlined_call_operand.vmem [shape: f32[1,128], index: 2, kind: input, shape index: {}]   ;;  %s574_s3 = inlined_call_operand.hbm [shape: f32[128,128], index: 3, kind: input, shape index: {}]   ;;  %s575_s4 = inlined_call_operand.vmem [shape: f32[1,128], index: 4, kind: input, shape index: {}]   ;;  %s576_s5 = inlined_call_operand.hbm [shape: f32[8,128], index: 5, kind: output, shape index: {}]  }
   0x1   :  { %11 = vsyncpa [#allocation6], 0 }
   0x2   :  { %12 = vsyncpa [#allocation4], 0  ;;  %s472_s18 = smov [#allocation5]   ;;  %s378_s22 = scalar_lea.hbm %s572_s1, 512 }
   0x3   :  { %s28_s19 = sshll.u32 %s472_s18, 4  ;;  %p379_p0 = scmp.ne.s32.totalorder %s572_s1, %s378_s22  ;;  %s29_s19 = int_to_ptr.vmem [resolvable:$true] %s28_s19 }
   0x4   :  { %p382_p1 = scmp.lt.u32.totalorder %s378_s22, %s572_s1 }
   0x6   :  { %p384_p2 = pnand %p382_p1, %p379_p0 }
   0x8   :  { %387 = shalt.err (!%p384_p2)
}
   0x9   :  { %s388_s27 = scalar_lea.vmem %s29_s19, 512  ;;  %p393_p4 = scmp.lt.s32.totalorder %s29_s19, %s29_s19 }
   0xa   :  { %p389_p3 = scmp.ne.s32.totalorder %s29_s19, %s388_s27  ;;  %p394_p5 = scmp.lt.s32.totalorder %s388_s27, %s388_s27 }
   0xc   :  { %p395_p6 = por %p394_p5, %p393_p4 }
   0xe   :  { %p396_p7 = pnand %p395_p6, %p389_p3 }
  0x10   :  { %399 = shalt.err (!%p396_p7)
}
  0x11   :  { %s473_s28 = smov 128   ;;  %s474_s29 = smov 8  }
  0x12   :  { %34 = dma.hbm_to_vmem [thread:$0]  %s572_s1, 512, %s29_s19, [#allocation6], %s473_s28, %s473_s28, %s474_s29  }
  0x13   :  { %s475_s7 = smov [#allocation2]   ;;  %s476_s9 = smov [#allocation7]  }
  0x14   :  { %s19_s8 = sshll.u32 %s475_s7, 4  ;;  %s42_s10 = sshll.u32 %s476_s9, 4  ;;  %s20_s8 = int_to_ptr.vmem [resolvable:$true] %s19_s8  ;;  %s43_s10 = int_to_ptr.vmem [resolvable:$true] %s42_s10 }
  0x15   :  { %s400_s13 = scalar_lea.hbm %s571_s0, 128 }
  0x16   :  { %p401_p8 = scmp.ne.s32.totalorder %s571_s0, %s400_s13  ;;  %p404_p9 = scmp.lt.u32.totalorder %s400_s13, %s571_s0 }
  0x18   :  { %p406_p10 = pnand %p404_p9, %p401_p8 }
  0x1a   :  { %409 = shalt.err (!%p406_p10)
}
  0x1b   :  { %s410_s1 = scalar_lea.vmem %s20_s8, 128  ;;  %p415_p12 = scmp.lt.s32.totalorder %s20_s8, %s20_s8 }
  0x1c   :  { %p411_p11 = scmp.ne.s32.totalorder %s20_s8, %s410_s1  ;;  %p416_p13 = scmp.lt.s32.totalorder %s410_s1, %s410_s1 }
  0x1e   :  { %p417_p0 = por %p416_p13, %p415_p12 }
  0x20   :  { %p418_p1 = pnand %p417_p0, %p411_p11 }
  0x22   :  { %421 = shalt.err (!%p418_p1)
}
  0x23   :  { %22 = dma.hbm_to_vmem [thread:$0]  %s571_s0, 128, %s20_s8, [#allocation3]  }
  0x24   :  { %s422_s22 = scalar_lea.hbm %s574_s3, 2048 }
  0x25   :  { %p423_p2 = scmp.ne.s32.totalorder %s574_s3, %s422_s22  ;;  %p426_p3 = scmp.lt.u32.totalorder %s422_s22, %s574_s3 }
  0x27   :  { %p428_p4 = pnand %p426_p3, %p423_p2 }
  0x29   :  { %431 = shalt.err (!%p428_p4)
}
  0x2a   :  { %s432_s27 = scalar_lea.vmem %s43_s10, 2048  ;;  %p437_p6 = scmp.lt.s32.totalorder %s43_s10, %s43_s10 }
  0x2b   :  { %p433_p5 = scmp.ne.s32.totalorder %s43_s10, %s432_s27  ;;  %p438_p7 = scmp.lt.s32.totalorder %s432_s27, %s432_s27 }
  0x2d   :  { %p439_p8 = por %p438_p7, %p437_p6 }
  0x2f   :  { %p440_p9 = pnand %p439_p8, %p433_p5 }
  0x31   :  { %443 = shalt.err (!%p440_p9)
}
  0x32   :  { %48 = dma.hbm_to_vmem [thread:$0]  %s574_s3, 2048, %s43_s10, [#allocation6], %s473_s28, %s473_s28, %s474_s29  }
  0x33   :  { %466 = dma.done.wait [#allocation3], 128  }
  0x34   :  { %467 = vsyncadd [#allocation3], 4294967168 }
  0x35   :  { %468 = dma.done.wait [#allocation6], 2560  }
  0x36   :  { %469 = vsyncadd [#allocation6], 4294964736  ;;  %v477_v0 = vmov 0.0|0.0   ;;  %vm478_vm0 = vmmov 0   ;;  %v479_v1 = vmov 0.0   ;;  %v62_v2 = vld [vmem:[#allocation5] sm:$0xff] }
  0x37   :  { %335 = vmatprep.subr.bf16.mxu0 %v477_v0  ;;  %297 = vmatprep.mubr.msk.f32.mxu0 %vm478_vm0, %v479_v1  ;;  %v63_v3 = vld [vmem:[#allocation5 + $0x8] sm:$0xff]  ;;  %v64_v4 = vld [vmem:[#allocation5 + $0x10] sm:$0xff]  ;;  %v65_v6 = vld [vmem:[#allocation5 + $0x18] sm:$0xff]  ;;  %vm73_vm1 = vcmask 261120   ;;  %s480_s7 = smov [#allocation8]  }
  0x38   :  { %341 = vmatprep.subr.bf16.mxu1 %v477_v0  ;;  %332 = vmatprep.mubr.msk.f32.mxu1 %vm478_vm0, %v479_v1  ;;  %v336_v5 = vpack.c.bf16 %v63_v3, %v62_v2  ;;  %v153_v7 = vld [vmem:[#allocation7] sm:$0xff]  ;;  %v154_v8 = vld [vmem:[#allocation7 + $0x8] sm:$0xff]  ;;  %v339_v9 = vpack.c.bf16 %v65_v6, %v64_v4  ;;  %v60_v10 = vld [vmem:[#allocation2] sm:$0xff]  ;;  %s253_s8 = sshll.u32 %s480_s7, 4  ;;  %s254_s8 = int_to_ptr.vmem [resolvable:$true] %s253_s8 }
  0x39   :  { %v342_v11 = vpack.c.bf16 %v154_v8, %v153_v7  ;;  %v61_v12 = vmax.f32 %v60_v10, 0.0  ;;  %v155_v13 = vld [vmem:[#allocation7 + $0x10] sm:$0xff]  ;;  %v156_v14 = vld [vmem:[#allocation7 + $0x18] sm:$0xff]  ;;  %v157_v16 = vld [vmem:[#allocation7 + $0x20] sm:$0xff]  ;;  %p449_p11 = scmp.lt.s32.totalorder %s254_s8, %s254_s8 }
  0x3a   :  { %337 = vmatpush3.bf16.msra.mxu0 %v336_v5  ;;  %v345_v15 = vpack.c.bf16 %v156_v14, %v155_v13  ;;  %v158_v17 = vld [vmem:[#allocation7 + $0x28] sm:$0xff]  ;;  %v159_v19 = vld [vmem:[#allocation7 + $0x30] sm:$0xff]  ;;  %v160_v20 = vld [vmem:[#allocation7 + $0x38] sm:$0xff] }
  0x3b   :  { %338 = vmatprep.subr.bf16.mxu0 %v477_v0  ;;  %343 = vmatpush3.bf16.msra.mxu1 %v342_v11  ;;  %v348_v18 = vpack.c.bf16 %v158_v17, %v157_v16  ;;  %v351_v21 = vpack.c.bf16 %v160_v20, %v159_v19  ;;  %v161_v22 = vld [vmem:[#allocation7 + $0x40] sm:$0xff]  ;;  %v162_v23 = vld [vmem:[#allocation7 + $0x48] sm:$0xff]  ;;  %v163_v25 = vld [vmem:[#allocation7 + $0x50] sm:$0xff] }
  0x3c   :  { %344 = vmatprep.subr.bf16.mxu1 %v477_v0  ;;  %v354_v24 = vpack.c.bf16 %v162_v23, %v161_v22  ;;  %v164_v26 = vld [vmem:[#allocation7 + $0x58] sm:$0xff]  ;;  %v165_v28 = vld [vmem:[#allocation7 + $0x60] sm:$0xff]  ;;  %v166_v29 = vld [vmem:[#allocation7 + $0x68] sm:$0xff] }
  0x3d   :  { %v357_v27 = vpack.c.bf16 %v164_v26, %v163_v25  ;;  %v360_v30 = vpack.c.bf16 %v166_v29, %v165_v28  ;;  %v167_v31 = vld [vmem:[#allocation7 + $0x70] sm:$0xff]  ;;  %v168_v32 = vld [vmem:[#allocation7 + $0x78] sm:$0xff] }
  0x3e   :  { %340 = vmatpush3.bf16.msra.mxu0 %v339_v9  ;;  %v363_v33 = vpack.c.bf16 %v168_v32, %v167_v31  ;;  %v263_v34 = vld [vmem:[%s573_s2] ss:$0 sm:$0xff]  ;;  %s444_s2 = scalar_lea.vmem %s254_s8, 128 }
  0x3f   :  { %346 = vmatpush3.bf16.msra.mxu1 %v345_v15  ;;  %v266_v42 = vld [vmem:[%s575_s4] ss:$0 sm:$0xff]  ;;  %p445_p10 = scmp.ne.s32.totalorder %s254_s8, %s444_s2  ;;  %p450_p12 = scmp.lt.s32.totalorder %s444_s2, %s444_s2 }
  0x40   :  { %347 = vmatprep.subr.bf16.mxu1 %v477_v0 }
  0x41   :  { %298 = vmatmul.mubr.msk.f32.vlgmr.msra.gmra.mrb[0].mxu0 %vm73_vm1, %v61_v12  ;;  %p451_p13 = por %p450_p12, %p449_p11 }
  0x43   :  { %349 = vmatpush3.bf16.msra.mxu1 %v348_v18  ;;  %p452_p0 = pnand %p451_p13, %p445_p10 }
  0x44   :  { %350 = vmatprep.subr.bf16.mxu1 %v477_v0 }
  0x47   :  { %352 = vmatpush3.bf16.msra.mxu1 %v351_v21 }
  0x48   :  { %353 = vmatprep.subr.bf16.mxu1 %v477_v0 }
  0x4b   :  { %355 = vmatpush3.bf16.msra.mxu1 %v354_v24 }
  0x4c   :  { %356 = vmatprep.subr.bf16.mxu1 %v477_v0 }
  0x4f   :  { %358 = vmatpush3.bf16.msra.mxu1 %v357_v27 }
  0x50   :  { %359 = vmatprep.subr.bf16.mxu1 %v477_v0 }
  0x53   :  { %361 = vmatpush3.bf16.msra.mxu1 %v360_v30 }
  0x54   :  { %362 = vmatprep.subr.bf16.mxu1 %v477_v0 }
  0x57   :  { %364 = vmatpush3.bf16.msra.mxu1 %v363_v33 }
 0x114   :  { %v143_v35 = vpop.f32.mrb[0].mxu0 }
 0x115   :  { %v144_v36 = vadd.f32 %v263_v34, %v143_v35  ;;  %v299_v37 = vpop.f32.mrb[1].mxu0 }
 0x117   :  { %v265_v38 = vmul.f32 -1.442695, %v144_v36 }
 0x119   :  { %374 = vpow2.f32 %v265_v38 }
 0x123   :  { %v375_v39 = vpop.eup %374 }
 0x124   :  { %v150_v40 = vadd.f32 1.0, %v375_v39 }
 0x126   :  { %376 = vrcp.f32 %v150_v40 }
 0x130   :  { %v377_v41 = vpop.eup %376 }
 0x131   :  { %333 = vmatmul.mubr.f32.vlgmr.msra.gmra.mrb[0].mxu1 %v377_v41 }
 0x204   :  { %v242_v43 = vpop.f32.mrb[0].mxu1 }
 0x205   :  { %v243_v44 = vadd.f32 %v266_v42, %v242_v43  ;;  %v334_v45 = vpop.f32.mrb[1].mxu1 }
 0x207   :  { %246 = vst [vmem:[#allocation8] sm:$0xff] %v243_v44 }
 0x208   :  { %455 = shalt.err (!%p452_p0)
}
 0x209   :  { %s456_s11 = scalar_lea.hbm %s576_s5, 128 }
 0x20a   :  { %p457_p1 = scmp.ne.s32.totalorder %s576_s5, %s456_s11  ;;  %p460_p2 = scmp.lt.u32.totalorder %s456_s11, %s576_s5 }
 0x20c   :  { %p462_p3 = pnand %p460_p2, %p457_p1 }
 0x20e   :  { %465 = shalt.err (!%p462_p3)
}
 0x20f   :  { %256 = dma.vmem_to_hbm [thread:$0]  %s254_s8, 128, %s576_s5, [#allocation4]  }
 0x210   :  { %470 = dma.done.wait [#allocation4], 128  }
 0x211   :  { %471 = vsyncadd [#allocation4], 4294967168 }
 0x212   :  { %260 = vsyncpa [#allocation3], 1 }
 0x213   :  { %261 = vsyncpa [#allocation6], 1 }
 0x214   :  { %262 = vsyncpa [#allocation4], 1 }

</bundles_post_ra>
